<compile_context>
chip_gen: v6e
topology: v6e:2x2x1
jax: 0.10.0
libtpu: 0.0.40
codegen_flags: <defaults>
</compile_context>

<pallas_src>
import functools
import math

import jax
import jax.numpy as jnp
from jax.experimental import pallas as pl
from jax.experimental.pallas import tpu as pltpu


d_model = 512
n_heads = 8
d_k = d_model // n_heads  # 64
d_v = d_model // n_heads  # 64


# ---------------------------------------------------------------------------
# Pallas kernel: one (batch, head-block, query-block) tile of attention.
# ---------------------------------------------------------------------------
def _sdpa_kernel(q_ref, k_ref, v_ref, mask_ref, ctx_ref, attn_ref, *, scale):
    # Shapes: q (HB, TQ, Dk), k (HB, S, Dk), v (HB, S, Dv), mask (TQ, S) int8,
    #         ctx (HB, TQ, Dv), attn (HB, TQ, S).
    q = q_ref[...] * scale          # fold 1/sqrt(d_k) into Q (TQ*Dk mults, not TQ*S)
    k = k_ref[...]
    v = v_ref[...]
    mask = mask_ref[...]

    # score[h, q, s] = sum_d q[h, q, d] * k[h, s, d]
    # Contracting the last dims of both operands lets the MXU consume K in its
    # stored layout (no XLU relayout of the K tile).
    score = jnp.einsum("hqd,hkd->hqk", q, k, preferred_element_type=jnp.float32)

    # masked_fill_(att_mask, -1e9); the same mask applies to every head.
    score = jnp.where(mask[None, :, :] != 0, jnp.float32(-1000000000.0), score)

    # Numerically stable softmax over the key axis.
    m = jnp.max(score, axis=-1, keepdims=True)
    e = jnp.exp(score - m)
    denom = jnp.sum(e, axis=-1, keepdims=True)
    # approx=True -> EUP vrcp slot (otherwise idle after exp).
    attn = e * pl.reciprocal(denom, approx=True)

    attn_ref[...] = attn.astype(attn_ref.dtype)

    # context = attn @ V (feed the MXU in V's storage dtype, accumulate f32).
    ctx = jnp.einsum("hqk,hkd->hqd", attn.astype(v.dtype), v,
                     preferred_element_type=jnp.float32)
    ctx_ref[...] = ctx.astype(ctx_ref.dtype)


# ---------------------------------------------------------------------------
# Tiling / compiler-parameter helpers.
# ---------------------------------------------------------------------------
def _vmem_limit_bytes():
    """~3/4 of physical VMEM: ~96 MiB on v5e/v6e (128 MiB), ~48 MiB on v7x (64 MiB)."""
    try:
        cap = pltpu.get_tpu_info().vmem_capacity_bytes
    except Exception:
        cap = 64 * 1024 * 1024
    limit = int(cap * 3 // 4)
    return max(32 * 1024 * 1024, min(limit, 100 * 1024 * 1024))


def _choose_tiles(H, S, Dk, Dv, itemsize, vmem_limit):
    """Pick (head-block HB, query-tile TQ) so the double-buffered working set fits."""
    tq = 128 if S % 128 == 0 else S  # 128 rows fills the MXU M dim on all gens

    def step_bytes(hb):
        q_b = hb * tq * Dk * itemsize
        kv_b = hb * S * (Dk + Dv) * itemsize
        ctx_b = hb * tq * Dv * itemsize
        attn_b = hb * tq * S * itemsize
        mask_b = tq * S                      # int8
        return 2 * (q_b + kv_b + ctx_b + attn_b + mask_b)  # double-buffered

    hb = 1
    for cand in range(H, 0, -1):
        if H % cand == 0 and step_bytes(cand) <= vmem_limit // 2:
            hb = cand
            break
    return hb, tq


# ---------------------------------------------------------------------------
# ScaleDotProductAttention.forward (Pallas).
# ---------------------------------------------------------------------------
def scale_dot_product_attention(Q, K, V, att_mask):
    """Q, K: [B, H, S, d_k]; V: [B, H, S, d_v];
    att_mask: [B, S, S] (or [B, H, S, S]) bool/int, True = mask out.
    Returns (context [B, H, S, d_v], attn [B, H, S, S])."""
    B, H, S, Dk = Q.shape
    Dv = V.shape[-1]
    scale = 1.0 / math.sqrt(Dk)

    # Per-head mask copies in the module are identical -> keep one copy per
    # batch and DMA it as int8 (1 byte/elem instead of 4, and H x fewer bytes).
    if att_mask.ndim == 4:
        att_mask = att_mask[:, 0]
    mask_i8 = att_mask.astype(jnp.int8)

    vmem_limit = _vmem_limit_bytes()
    HB, TQ = _choose_tiles(H, S, Dk, Dv, Q.dtype.itemsize, vmem_limit)
    # TODO(synk): for very long S a KV-block axis + online-softmax accumulator
    # would bound K/V VMEM too, but the module requires the full attn matrix
    # output, so O(S^2) HBM traffic is inherent to its semantics.

    kernel = functools.partial(_sdpa_kernel, scale=scale)
    grid = (B, H // HB, S // TQ)

    # Query axis innermost: K/V block indices are constant across it, so Pallas
    # keeps those tiles resident instead of re-DMAing them.
    q_spec = pl.BlockSpec((None, HB, TQ, Dk), lambda b, h, qi: (b, h, qi, 0))
    k_spec = pl.BlockSpec((None, HB, S, Dk), lambda b, h, qi: (b, h, 0, 0))
    v_spec = pl.BlockSpec((None, HB, S, Dv), lambda b, h, qi: (b, h, 0, 0))
    m_spec = pl.BlockSpec((None, TQ, S), lambda b, h, qi: (b, qi, 0))
    ctx_spec = pl.BlockSpec((None, HB, TQ, Dv), lambda b, h, qi: (b, h, qi, 0))
    attn_spec = pl.BlockSpec((None, HB, TQ, S), lambda b, h, qi: (b, h, qi, 0))

    context, attn = pl.pallas_call(
        kernel,
        out_shape=(
            jax.ShapeDtypeStruct((B, H, S, Dv), Q.dtype),
            jax.ShapeDtypeStruct((B, H, S, S), Q.dtype),
        ),
        grid_spec=pltpu.PrefetchScalarGridSpec(
            num_scalar_prefetch=0,
            grid=grid,
            in_specs=[q_spec, k_spec, v_spec, m_spec],
            out_specs=[ctx_spec, attn_spec],
        ),
        compiler_params=pltpu.CompilerParams(
            dimension_semantics=("parallel", "parallel", "parallel"),
            vmem_limit_bytes=vmem_limit,
        ),
    )(Q, K, V, mask_i8)
    return context, attn


# ---------------------------------------------------------------------------
# MutiHeadAttention.forward.
# ---------------------------------------------------------------------------
def muti_head_attention(q, k, v, attn_mask, weights):
    """q, k, v: [B, S, d_model]; attn_mask: [B, S, S] bool (True = mask out)."""
    B, S, _ = q.shape
    residual = q

    def split_heads(x, d):
        return x.reshape(B, S, n_heads, d).transpose(0, 2, 1, 3)

    Q = split_heads(q @ weights["W_q"], d_k)
    K = split_heads(k @ weights["W_k"], d_k)
    V = split_heads(v @ weights["W_v"], d_v)

    context, attn = scale_dot_product_attention(Q, K, V, attn_mask)

    context = context.transpose(0, 2, 1, 3).reshape(B, S, n_heads * d_v)
    output = context @ weights["W_o"]

    x = output + residual
    # nn.LayerNorm(d_model) with default weight=1, bias=0, eps=1e-5.
    mean = jnp.mean(x, axis=-1, keepdims=True)
    var = jnp.mean(jnp.square(x - mean), axis=-1, keepdims=True)
    out = (x - mean) * jax.lax.rsqrt(var + 1e-5)
    return out, attn


# ---------------------------------------------------------------------------
# Pure-JAX references.
# ---------------------------------------------------------------------------
def _sdpa_reference(Q, K, V, att_mask):
    Dk = Q.shape[-1]
    score = jnp.einsum("bhqd,bhkd->bhqk", Q, K) / jnp.sqrt(jnp.float32(Dk))
    score = jnp.where(att_mask[:, None, :, :], jnp.float32(-1000000000.0), score)
    attn = jax.nn.softmax(score, axis=-1)
    context = jnp.einsum("bhqk,bhkd->bhqd", attn, V)
    return context, attn


def _mha_reference(q, k, v, attn_mask, weights):
    B, S, _ = q.shape

    def split_heads(x, d):
        return x.reshape(B, S, n_heads, d).transpose(0, 2, 1, 3)

    Q = split_heads(q @ weights["W_q"], d_k)
    K = split_heads(k @ weights["W_k"], d_k)
    V = split_heads(v @ weights["W_v"], d_v)
    ctx, attn = _sdpa_reference(Q, K, V, attn_mask)
    ctx = ctx.transpose(0, 2, 1, 3).reshape(B, S, n_heads * d_v)
    x = ctx @ weights["W_o"] + q
    mean = jnp.mean(x, axis=-1, keepdims=True)
    var = jnp.mean(jnp.square(x - mean), axis=-1, keepdims=True)
    return (x - mean) * jax.lax.rsqrt(var + 1e-5), attn


if __name__ == "__main__":
    B, S = 2, 8  # batch, sequence length (d_model=512, n_heads=8, d_k=d_v=64)

    key = jax.random.PRNGKey(0)
    kq, kk, kv, km, kwq, kwk, kwv, kwo = jax.random.split(key, 8)

    q = jax.random.normal(kq, (B, S, d_model), dtype=jnp.float32)
    k = jax.random.normal(kk, (B, S, d_model), dtype=jnp.float32)
    v = jax.random.normal(kv, (B, S, d_model), dtype=jnp.float32)
    # Padding-style mask, shared across heads (True = masked out).
    attn_mask = jax.random.bernoulli(km, p=0.25, shape=(B, S, S))

    init = 1.0 / math.sqrt(d_model)
    weights = {
        "W_q": jax.random.uniform(kwq, (d_model, n_heads * d_k), jnp.float32, -init, init),
        "W_k": jax.random.uniform(kwk, (d_model, n_heads * d_k), jnp.float32, -init, init),
        "W_v": jax.random.uniform(kwv, (d_model, n_heads * d_v), jnp.float32, -init, init),
        "W_o": jax.random.uniform(kwo, (n_heads * d_v, d_model), jnp.float32, -init, init),
    }

    out, attn = muti_head_attention(q, k, v, attn_mask, weights)
    jax.block_until_ready((out, attn))

    out_ref, attn_ref = _mha_reference(q, k, v, attn_mask, weights)
    # Tolerance 1e-2 because of the approx EUP reciprocal in the softmax
    # normalizer (everything else is f32-exact).
    assert jnp.allclose(attn, attn_ref, atol=1e-2, rtol=1e-2), "attn mismatch"
    assert jnp.allclose(out, out_ref, atol=1e-2, rtol=1e-2), "output mismatch"

    print("KERNEL_OK")
</pallas_src>

<mosaic_0001>
module attributes {stable_mosaic.version = 11 : i64} {
  func.func @_sdpa_kernel(%arg0: i32, %arg1: i32, %arg2: i32, %arg3: memref<1x8x8x64xf32, #tpu.memory_space<vmem>>, %arg4: memref<1x8x8x64xf32, #tpu.memory_space<vmem>>, %arg5: memref<1x8x8x64xf32, #tpu.memory_space<vmem>>, %arg6: memref<1x8x8xi8, #tpu.memory_space<vmem>>, %arg7: memref<1x8x8x64xf32, #tpu.memory_space<vmem>>, %arg8: memref<1x8x8x8xf32, #tpu.memory_space<vmem>>) attributes {dimension_semantics = [#tpu.dimension_semantics<parallel>, #tpu.dimension_semantics<parallel>, #tpu.dimension_semantics<parallel>], iteration_bounds = array<i64: 2, 1, 1>, scalar_prefetch = 0 : i64, scratch_operands = 0 : i64, tpu.core_type = #tpu.core_type<tc>, window_params = [{transform_indices = @transform_0, window_bounds = array<i64: 1, 8, 8, 64>}, {transform_indices = @transform_1, window_bounds = array<i64: 1, 8, 8, 64>}, {transform_indices = @transform_2, window_bounds = array<i64: 1, 8, 8, 64>}, {transform_indices = @transform_3, window_bounds = array<i64: 1, 8, 8>}, {transform_indices = @transform_4, window_bounds = array<i64: 1, 8, 8, 64>}, {transform_indices = @transform_5, window_bounds = array<i64: 1, 8, 8, 8>}]} {
    %c0 = arith.constant 0 : index
    %c0_0 = arith.constant 0 : index
    %c0_1 = arith.constant 0 : index
    %c0_2 = arith.constant 0 : index
    %0 = vector.load %arg3[%c0, %c0_0, %c0_1, %c0_2] : memref<1x8x8x64xf32, #tpu.memory_space<vmem>>, vector<1x8x8x64xf32>
    %1 = vector.shape_cast %0 : vector<1x8x8x64xf32> to vector<8x8x64xf32>
    %cst = arith.constant 1.250000e-01 : f32
    %2 = vector.broadcast %cst : f32 to vector<8x8x64xf32>
    %3 = arith.mulf %1, %2 : vector<8x8x64xf32>
    %c0_3 = arith.constant 0 : index
    %c0_4 = arith.constant 0 : index
    %c0_5 = arith.constant 0 : index
    %c0_6 = arith.constant 0 : index
    %4 = vector.load %arg4[%c0_3, %c0_4, %c0_5, %c0_6] : memref<1x8x8x64xf32, #tpu.memory_space<vmem>>, vector<1x8x8x64xf32>
    %5 = vector.shape_cast %4 : vector<1x8x8x64xf32> to vector<8x8x64xf32>
    %c0_7 = arith.constant 0 : index
    %c0_8 = arith.constant 0 : index
    %c0_9 = arith.constant 0 : index
    %c0_10 = arith.constant 0 : index
    %6 = vector.load %arg5[%c0_7, %c0_8, %c0_9, %c0_10] : memref<1x8x8x64xf32, #tpu.memory_space<vmem>>, vector<1x8x8x64xf32>
    %7 = vector.shape_cast %6 : vector<1x8x8x64xf32> to vector<8x8x64xf32>
    %c0_11 = arith.constant 0 : index
    %c0_12 = arith.constant 0 : index
    %c0_13 = arith.constant 0 : index
    %8 = vector.load %arg6[%c0_11, %c0_12, %c0_13] : memref<1x8x8xi8, #tpu.memory_space<vmem>>, vector<1x8x8xi8>
    %9 = vector.shape_cast %8 : vector<1x8x8xi8> to vector<8x8xi8>
    "tpu.trace_start"() <{level = 10 : i32, message = "hqd,hkd->hqk"}> : () -> ()
    %cst_14 = arith.constant dense<0.000000e+00> : vector<8x8x8xf32>
    %10 = tpu.matmul %3, %5, %cst_14 {dimension_numbers = #tpu.dot_dimension_numbers<[2], [2], [1], [1], [0, 0, 0, 1, 1, 1], [0], [0]>} : vector<8x8x64xf32>, vector<8x8x64xf32>, vector<8x8x8xf32> -> vector<8x8x8xf32>
    "tpu.trace_stop"() : () -> ()
    %11 = vector.shape_cast %9 : vector<8x8xi8> to vector<1x8x8xi8>
    %c0_i8 = arith.constant 0 : i8
    %12 = vector.broadcast %c0_i8 : i8 to vector<1x8x8xi8>
    %13 = arith.cmpi ne, %11, %12 : vector<1x8x8xi8>
    %cst_15 = arith.constant -1.000000e+09 : f32
    %14 = vector.shape_cast %13 : vector<1x8x8xi1> to vector<1x8x8xi1>
    %15 = vector.broadcast %14 : vector<1x8x8xi1> to vector<8x8x8xi1>
    %16 = vector.broadcast %cst_15 : f32 to vector<8x8x8xf32>
    %17 = arith.select %15, %16, %10 : vector<8x8x8xi1>, vector<8x8x8xf32>
    %cst_16 = arith.constant dense<0xFF800000> : vector<8x8xf32>
    %18 = vector.multi_reduction <maximumf>, %17, %cst_16 [2] : vector<8x8x8xf32> to vector<8x8xf32>
    %19 = vector.shape_cast %18 : vector<8x8xf32> to vector<8x8x1xf32>
    %20 = vector.broadcast %19 : vector<8x8x1xf32> to vector<8x8x8xf32>
    %21 = arith.subf %17, %20 : vector<8x8x8xf32>
    %22 = math.exp %21 : vector<8x8x8xf32>
    %cst_17 = arith.constant dense<0.000000e+00> : vector<8x8xf32>
    %23 = vector.multi_reduction <add>, %22, %cst_17 [2] : vector<8x8x8xf32> to vector<8x8xf32>
    %24 = vector.shape_cast %23 : vector<8x8xf32> to vector<8x8x1xf32>
    %25 = tpu.reciprocal %24 {approx = true} : vector<8x8x1xf32> -> vector<8x8x1xf32>
    %26 = vector.broadcast %25 : vector<8x8x1xf32> to vector<8x8x8xf32>
    %27 = arith.mulf %22, %26 : vector<8x8x8xf32>
    %c0_18 = arith.constant 0 : index
    %c0_19 = arith.constant 0 : index
    %c0_20 = arith.constant 0 : index
    %c0_21 = arith.constant 0 : index
    %28 = vector.load %arg8[%c0_18, %c0_19, %c0_20, %c0_21] : memref<1x8x8x8xf32, #tpu.memory_space<vmem>>, vector<1x8x8x8xf32>
    %29 = vector.shape_cast %28 : vector<1x8x8x8xf32> to vector<8x8x8xf32>
    %30 = vector.shape_cast %27 : vector<8x8x8xf32> to vector<1x8x8x8xf32>
    tpu.vector_store %arg8[%c0_18, %c0_19, %c0_20, %c0_21], %30 {strides = array<i32>} : memref<1x8x8x8xf32, #tpu.memory_space<vmem>>, vector<1x8x8x8xf32>,
    "tpu.trace_start"() <{level = 10 : i32, message = "hqk,hkd->hqd"}> : () -> ()
    %cst_22 = arith.constant dense<0.000000e+00> : vector<8x8x64xf32>
    %31 = tpu.matmul %27, %7, %cst_22 {dimension_numbers = #tpu.dot_dimension_numbers<[2], [1], [1], [2], [0, 0, 0, 1, 1, 2], [0], [0]>} : vector<8x8x8xf32>, vector<8x8x64xf32>, vector<8x8x64xf32> -> vector<8x8x64xf32>
    "tpu.trace_stop"() : () -> ()
    %c0_23 = arith.constant 0 : index
    %c0_24 = arith.constant 0 : index
    %c0_25 = arith.constant 0 : index
    %c0_26 = arith.constant 0 : index
    %32 = vector.load %arg7[%c0_23, %c0_24, %c0_25, %c0_26] : memref<1x8x8x64xf32, #tpu.memory_space<vmem>>, vector<1x8x8x64xf32>
    %33 = vector.shape_cast %32 : vector<1x8x8x64xf32> to vector<8x8x64xf32>
    %34 = vector.shape_cast %31 : vector<8x8x64xf32> to vector<1x8x8x64xf32>
    tpu.vector_store %arg7[%c0_23, %c0_24, %c0_25, %c0_26], %34 {strides = array<i32>} : memref<1x8x8x64xf32, #tpu.memory_space<vmem>>, vector<1x8x8x64xf32>,
    return
  }
  func.func @transform_0(%arg0: i32, %arg1: i32, %arg2: i32) -> (i32, i32, i32, i32) {
    %c0_i32 = arith.constant 0 : i32
    %c0_i32_0 = arith.constant 0 : i32
    return %arg0, %arg1, %arg2, %c0_i32 : i32, i32, i32, i32
  }
  func.func @transform_1(%arg0: i32, %arg1: i32, %arg2: i32) -> (i32, i32, i32, i32) {
    %c0_i32 = arith.constant 0 : i32
    %c0_i32_0 = arith.constant 0 : i32
    %c0_i32_1 = arith.constant 0 : i32
    return %arg0, %arg1, %c0_i32, %c0_i32_0 : i32, i32, i32, i32
  }
  func.func @transform_2(%arg0: i32, %arg1: i32, %arg2: i32) -> (i32, i32, i32, i32) {
    %c0_i32 = arith.constant 0 : i32
    %c0_i32_0 = arith.constant 0 : i32
    %c0_i32_1 = arith.constant 0 : i32
    return %arg0, %arg1, %c0_i32, %c0_i32_0 : i32, i32, i32, i32
  }
  func.func @transform_3(%arg0: i32, %arg1: i32, %arg2: i32) -> (i32, i32, i32) {
    %c0_i32 = arith.constant 0 : i32
    %c0_i32_0 = arith.constant 0 : i32
    return %arg0, %arg2, %c0_i32 : i32, i32, i32
  }
  func.func @transform_4(%arg0: i32, %arg1: i32, %arg2: i32) -> (i32, i32, i32, i32) {
    %c0_i32 = arith.constant 0 : i32
    %c0_i32_0 = arith.constant 0 : i32
    return %arg0, %arg1, %arg2, %c0_i32 : i32, i32, i32, i32
  }
  func.func @transform_5(%arg0: i32, %arg1: i32, %arg2: i32) -> (i32, i32, i32, i32) {
    %c0_i32 = arith.constant 0 : i32
    %c0_i32_0 = arith.constant 0 : i32
    return %arg0, %arg1, %arg2, %c0_i32 : i32, i32, i32, i32
  }
}

</mosaic_0001>

<bundles_post_ra>
// kernel: tpu_custom_call.1
= control target key start
LH: loop header
LB: loop body
LE: loop exit
PB: predicated region body
PF: predicated region fallthrough
CT: control target
= control target key end

     0   :  { %s2959_s0 = inlined_call_operand.hbm [shape: f32[2,8,8,64], index: 0, kind: input, shape index: {}]   ;;  %s2960_s1 = inlined_call_operand.hbm [shape: f32[2,8,8,64], index: 1, kind: input, shape index: {}]   ;;  %s2961_s2 = inlined_call_operand.hbm [shape: f32[2,8,8,64], index: 2, kind: input, shape index: {}]   ;;  %s2962_s3 = inlined_call_operand.vmem [shape: s8[2,8,8], index: 3, kind: input, shape index: {}]   ;;  %s2963_s4 = inlined_call_operand.hbm [shape: f32[2,8,8,64], index: 4, kind: output, shape index: {0}]   ;;  %s2964_s5 = inlined_call_operand.hbm [shape: f32[2,8,8,8], index: 5, kind: output, shape index: {1}]  }
   0x1   :  { %2972 = sst [smem:[#allocation20_spill]] %s2960_s1 }
   0x2   :  { %11 = vsyncpa [#allocation3], 0 }
   0x3   :  { %13 = vsyncpa [#allocation3 + $0x1], 0 }
   0x4   :  { %14 = vsyncpa [#allocation6], 0 }
   0x5   :  { %16 = vsyncpa [#allocation6 + $0x1], 0 }
   0x6   :  { %17 = vsyncpa [#allocation4], 0 }
   0x7   :  { %19 = vsyncpa [#allocation4 + $0x1], 0 }
   0x8   :  { %20 = vsyncpa [#allocation10], 0 }
   0x9   :  { %22 = vsyncpa [#allocation10 + $0x1], 0  ;;  %s2513_s18 = smov 0   ;;  %s2515_s19 = smov 0  }
   0xa   :  { %s2517_s20 = smov 0   ;;  %s2519_s21 = smov 0  }
   0xb   :  { %s2521_s22 = smov 0   ;;  %s2523_s23 = smov 0  }
   0xc LB: > { %2973 = sst [smem:[#allocation15_spill]] %s2449_s18  ;;  %s2544_s24 = sadd.s32 4294967295, %s2469_s23   ;;  %s2469_s23 = sphi %s2523_s23, %s28_s23   ;;  %s2465_s22 = sphi %s2521_s22, %s2994_s22   ;;  %s2461_s21 = sphi %s2519_s21, %s2993_s21   ;;  %s2457_s20 = sphi %s2517_s20, %s2997_s20   ;;  %s2453_s19 = sphi %s2515_s19, %s2996_s19   ;;  %s2449_s18 = sphi %s2513_s18, %s2995_s18  }
   0xd   : > { %2974 = sst [smem:[#allocation16_spill]] %s2465_s22  ;;  %s1987_s25 = sadd.s32 4294967294, %s2469_s23  }
   0xe   : > { %s47_s26 = sadd.s32 1, %s2465_s22  ;;  %s58_s27 = sadd.s32 1, %s2457_s20 }
   0xf   : > { %p49_p0 = scmp.ge.s32.totalorder %s47_s26, 2  ;;  %p65_p1 = scmp.ne.s32.totalorder %s2457_s20, %s2453_s19 }
  0x10   : > { %p66_p2 = scmp.eq.s32.totalorder %s2469_s23, 0  ;;  %p71_p3 = scmp.ne.s32.totalorder %s2453_s19, %s2449_s18 }
  0x11   : > { %s2999_s26 = smov (%p49_p0, %s47_s26), 0  ;;  %p72_p5 = scmp.eq.s32.totalorder %s2544_s24, 0 }
  0x12   : > { %2975 = sst [smem:[#allocation17_spill]] %s2999_s26  ;;  %p2556_p4 = por %p66_p2, %p65_p1 }
  0x13   : > { %s51_s29 = ssub.s32 %s2465_s22, %s2999_s26  ;;  %p183_p6 = scmp.eq.s32.totalorder %s2544_s24, 1 }
  0x14   : > { %p56_p7 = scmp.eq.s32.totalorder %s51_s29, 0  ;;  %p2564_p8 = por %p72_p5, %p71_p3 }
  0x15   : > { %p2568_p9 = por %p183_p6, %p65_p1  ;;  %p189_p10 = scmp.eq.s32.totalorder %s1987_s25, 1 }
  0x16   : > { %s2573_s7 = scalar_select %p56_p7, %s2457_s20, %s58_s27  }
  0x17   : > { %p2575_p11 = por %p189_p10, %p71_p3  ;;  %p2182_p13 = scmp.lt.s32.totalorder %s2469_s23, 2 }
  0x18   : > { %2979 = sst [smem:[#allocation18_spill]] %s2573_s7  ;;  %s2965_s9 = sand.u32 1, %s2457_s20  }
  0x19   : > { %s2980_s8 = scalar_select %p2575_p11, 1, 0 }
  0x1a   : > { %s2584_s10 = sshll.u32 %s2965_s9, 6  ;;  %s2587_s11 = sshll.u32 %s2465_s22, 10 }
  0x1b   : > { %2981 = sst [smem:[#allocation19_spill]] %s2980_s8  ;;  %p2591_p0 = pnand %p2182_p13, %p2556_p4 }
  0x1c   : > { %s263_s13 = sand.u32 1, %s2469_s23   ;;  %s2983_s1 = sld [smem:[#allocation20_spill]] }
  0x1d   : > { %s267_s17 = scalar_lea.vmem [#allocation5], %s2584_s10  ;;  %p1999_p1 = scmp.ge.s32.totalorder %s2469_s23, 1 }
  0x1e   : > { %s276_s25 = sshll.u32 %s267_s17, 4  ;;  %p317_p2 = scmp.lt.s32.totalorder %s2469_s23, 3  ;;  %s277_s25 = int_to_ptr.vmem [resolvable:$true] %s276_s25 }
  0x1f   : > { %s2603_s27 = scalar_lea.sflag [#allocation6], %s263_s13  ;;  %p2273_p3 = pneg %p2591_p0 }
  0x20   : > { %s2284_s28 = scalar_lea.vmem %s277_s25, 1024  ;;  %s2471_s29 = smov [#allocation5]  }
  0x21   : > { %p2285_p4 = scmp.ne.s32.totalorder %s277_s25, %s2284_s28  ;;  %s2289_s9 = sshll.u32 %s2471_s29, 4  ;;  %s2290_s9 = int_to_ptr.vmem [resolvable:$false] %s2289_s9 }
  0x22   : > { %s275_s16 = scalar_lea.hbm %s2983_s1, %s2587_s11  ;;  %s2291_s14 = scalar_lea.vmem %s2290_s9, 2048 }
  0x23   : > { %p2287_p5 = pnand %p2285_p4, %p2273_p3  ;;  %p2292_p7 = scmp.lt.s32.totalorder %s277_s25, %s2290_s9 }
  0x24   : > { %p2293_p10 = scmp.lt.s32.totalorder %s2291_s14, %s2284_s28 }
  0x25   : > { %p2288_p6 = pneg %p2287_p5 }
  0x26   : > { %p2294_p13 = por %p2293_p10, %p2292_p7 }
  0x28   : > { %p2295_p12 = pnand %p2294_p13, %p2288_p6 }
  0x2a   : > { %2298 = shalt.err (!%p2295_p12)
}
  0x2b   : > { %s2970_s15 = smov 128   ;;  %s2473_s13 = smov 8  }
  0x2c   : > { %2171 = dma.hbm_to_vmem [thread:$0]  (!%p2591_p0), %s275_s16, 1024, %s277_s25, %s2603_s27, %s2970_s15, %s2970_s15, %s2473_s13  }
  0x2d   : > { %p2620_p4 = pnand %p1999_p1, %p317_p2  ;;  %s252_s29 = scalar_lea.hbm %s2959_s0, %s2587_s11 }
  0x2e   : > { %s243_s14 = scalar_lea.vmem [#allocation2], %s2584_s10  ;;  %s298_s7 = scalar_lea.hbm %s2961_s2, %s2587_s11 }
  0x2f   : > { %s253_s1 = sshll.u32 %s243_s14, 4  ;;  %s2985_s8 = sand.u32 1, %s2457_s20   ;;  %s254_s1 = int_to_ptr.vmem [resolvable:$true] %s253_s1 }
  0x30   : > { %s240_s18 = scalar_lea.sflag [#allocation3], %s2985_s8  ;;  %s2312_s16 = scalar_lea.vmem %s254_s1, 1024 }
  0x31   : > { %p2313_p12 = scmp.ne.s32.totalorder %s254_s1, %s2312_s16  ;;  %s2474_s25 = smov [#allocation2]  }
  0x32   : > { %s2317_s15 = sshll.u32 %s2474_s25, 4  ;;  %s2318_s15 = int_to_ptr.vmem [resolvable:$false] %s2317_s15 }
  0x33   : > { %p2315_p1 = pnand %p2313_p12, %p2273_p3  ;;  %s2319_s17 = scalar_lea.vmem %s2318_s15, 2048 }
  0x34   : > { %p2320_p5 = scmp.lt.s32.totalorder %s254_s1, %s2318_s15  ;;  %p2321_p6 = scmp.lt.s32.totalorder %s2319_s17, %s2312_s16 }
  0x35   : > { %p2316_p2 = pneg %p2315_p1 }
  0x36   : > { %p2322_p7 = por %p2321_p6, %p2320_p5 }
  0x38   : > { %p2323_p10 = pnand %p2322_p7, %p2316_p2 }
  0x3a   : > { %2326 = shalt.err (!%p2323_p10)
}
  0x3b   : > { %s2986_s22 = smov 128   ;;  %s290_s26 = scalar_lea.vmem [#allocation7], %s2584_s10 }
  0x3c   : > { %2168 = dma.hbm_to_vmem [thread:$0]  (!%p2591_p0), %s252_s29, 1024, %s254_s1, %s240_s18, %s2986_s22, %s2986_s22, %s2473_s13  }
  0x3d   : > { %s299_s8 = sshll.u32 %s290_s26, 4  ;;  %s2475_s15 = smov [#allocation7]   ;;  %s300_s8 = int_to_ptr.vmem [resolvable:$true] %s299_s8 }
  0x3e   : > { %s2340_s28 = scalar_lea.vmem %s300_s8, 1024  ;;  %s2345_s14 = sshll.u32 %s2475_s15, 4  ;;  %s2346_s14 = int_to_ptr.vmem [resolvable:$false] %s2345_s14 }
  0x3f   : > { %p2341_p13 = scmp.ne.s32.totalorder %s300_s8, %s2340_s28  ;;  %s2347_s16 = scalar_lea.vmem %s2346_s14, 2048 }
  0x40   : > { %p2348_p2 = scmp.lt.s32.totalorder %s300_s8, %s2346_s14  ;;  %p2349_p5 = scmp.lt.s32.totalorder %s2347_s16, %s2340_s28 }
  0x41   : > { %p2343_p12 = pnand %p2341_p13, %p2273_p3 }
  0x42   : > { %p2350_p6 = por %p2349_p5, %p2348_p2 }
  0x43   : > { %p2344_p1 = pneg %p2343_p12 }
  0x45   : > { %p2351_p7 = pnand %p2350_p6, %p2344_p1 }
  0x47   : > { %2354 = shalt.err (!%p2351_p7)
}
  0x48   : > { %2174 = dma.hbm_to_vmem [thread:$0]  (!%p2591_p0), %s298_s7, 1024, %s300_s8, %s2603_s27, %s2986_s22, %s2986_s22, %s2473_s13  }
  0x49   : > { %321 = sbr.rel (%p2620_p4) target bundleno = 817 (0x331), region = 36  ;;  %s2661_s10 = sand.u32 (!%p2620_p4), 1, %s2453_s19  }
  0x4a   : > { %s2664_s12 = sshll.u32 (!%p2620_p4), %s2661_s10, 6  ;;  %s324_s29 = scalar_lea.sflag (!%p2620_p4), [#allocation3], %s2661_s10 }
  0x4b   : > { %s2668_s25 = scalar_lea.vmem (!%p2620_p4), [#allocation2], %s2664_s12 }
  0x4e   : > { %2432 = dma.done.wait (%p2564_p8), %s324_s29, 1024  }
  0x4f   : > { %2434 = vsyncadd (%p2564_p8), %s324_s29, 4294966272  ;;  %s332_s7 = sand.u32 1, %s2544_s24   ;;  %s2676_s27 = scalar_lea.vmem [#allocation5], %s2664_s12 }
  0x50   : > { %s333_s11 = scalar_lea.sflag [#allocation6], %s332_s7 }
  0x51   : > { %2436 = dma.done.wait (%p2564_p8), %s333_s11, 2048  }
  0x52   : > { %2438 = vsyncadd (%p2564_p8), %s333_s11, 4294965248  ;;  %v2476_v0 = vmov 0.0   ;;  %vm2477_vm0 = vmmov 0   ;;  %vm441_vm1 = vcmask 523264   ;;  %v424_v1 = vld [vmem:[%s2676_s27] sm:$0xff]  ;;  %v425_v3 = vld [vmem:[%s2676_s27 + $0x8] sm:$0xff] }
  0x53   : > { %2075 = vmatprep.subr.mxu0 %v2476_v0  ;;  %2077 = vmatprep.mubr.msk.f32.mxu0 %vm2477_vm0, %v2476_v0  ;;  %v408_v2 = vld [vmem:[%s2668_s25] sm:$0xff]  ;;  %v409_v5 = vld [vmem:[%s2668_s25 + $0x8] sm:$0xff]  ;;  %v410_v6 = vld [vmem:[%s2668_s25 + $0x10] sm:$0xff]  ;;  %p397_p8 = scmp.lt.s32.totalorder %s2461_s21, 1  ;;  %v2478_v26 = vmov 0   ;;  %vm1064_vm4 = vcmask 64512  }
  0x54   : > { %2080 = vmatprep.subr.mxu1 %v2476_v0  ;;  %2082 = vmatprep.mubr.msk.f32.mxu1 %vm2477_vm0, %v2476_v0  ;;  %v416_v4 = vmul.f32 0.125, %v408_v2  ;;  %v426_v7 = vld [vmem:[%s2676_s27 + $0x10] sm:$0xff]  ;;  %v417_v8 = vmul.f32 0.125, %v409_v5  ;;  %v411_v9 = vld [vmem:[%s2668_s25 + $0x18] sm:$0xff]  ;;  %v418_v11 = vmul.f32 0.125, %v410_v6  ;;  %v412_v13 = vld [vmem:[%s2668_s25 + $0x20] sm:$0xff] }
  0x55   : > { %2076 = vmatpush3.xpose.msk.msra.mxu0 %vm441_vm1, %v424_v1  ;;  %2081 = vmatpush3.xpose.msk.msra.mxu1 %vm441_vm1, %v425_v3  ;;  %v427_v10 = vld [vmem:[%s2676_s27 + $0x18] sm:$0xff]  ;;  %v419_v12 = vmul.f32 0.125, %v411_v9  ;;  %v428_v14 = vld [vmem:[%s2676_s27 + $0x20] sm:$0xff]  ;;  %v413_v15 = vld [vmem:[%s2668_s25 + $0x28] sm:$0xff]  ;;  %v420_v17 = vmul.f32 0.125, %v412_v13  ;;  %s398_s24 = scalar_select %p397_p8, %s2461_s21, 1 }
  0x56   : > { %2085 = vmatprep.subr.mxu0 %v2476_v0  ;;  %2090 = vmatprep.subr.mxu1 %v2476_v0  ;;  %v429_v16 = vld [vmem:[%s2676_s27 + $0x28] sm:$0xff]  ;;  %v421_v18 = vmul.f32 0.125, %v413_v15  ;;  %v414_v19 = vld [vmem:[%s2668_s25 + $0x30] sm:$0xff]  ;;  %v415_v21 = vld [vmem:[%s2668_s25 + $0x38] sm:$0xff]  ;;  %s2798_s22 = scalar_lea.vmem [#allocation7], %s2664_s12  ;;  %s2806_s26 = scalar_lea.vmem [#allocation9], %s2664_s12 }
  0x57   : > { %v430_v20 = vld [vmem:[%s2676_s27 + $0x30] sm:$0xff]  ;;  %v431_v22 = vld [vmem:[%s2676_s27 + $0x38] sm:$0xff]  ;;  %v422_v23 = vmul.f32 0.125, %v414_v19  ;;  %v423_v24 = vmul.f32 0.125, %v415_v21  ;;  %s2005_s30 = sshll.u32 %s398_s24, 1  ;;  %s2041_s8 = sshll.u32 %s2461_s21, 10 }
  0x58   : > { %2078 = vmatmul.mubr.msk.f32.vlgmr.msra.gmra.mxu0 %vm441_vm1, %v416_v4  ;;  %2083 = vmatmul.mubr.msk.f32.vlgmr.msra.gmra.mxu1 %vm441_vm1, %v417_v8  ;;  %s403_s17 = scalar_lea.vmem %s2962_s3, %s2005_s30  ;;  %s1794_s28 = sshll.u32 %s2806_s26, 4  ;;  %s2866_s28 = int_to_ptr.vmem [resolvable:$true] %s1794_s28 }
  0x59   : > { %2086 = vmatpush3.xpose.msk.msra.mxu0 %vm441_vm1, %v426_v7  ;;  %2087 = vmatprep.mubr.msk.f32.mxu0 %vm2477_vm0, %v2476_v0  ;;  %v440_v25 = vld [vmem:[%s403_s17] sm:$0x3]  ;;  %s2864_s16 = scalar_lea.hbm %s2964_s5, %s2041_s8  ;;  %s1759_s1 = scalar_lea.sflag [#allocation10], %s2661_s10 }
  0x5a   : > { %2091 = vmatpush3.xpose.msk.msra.mxu1 %vm441_vm1, %v427_v10  ;;  %2095 = vmatprep.subr.mxu0 %v2476_v0  ;;  %vm1050_vm2 = vnez %v440_v25  ;;  %s2355_s18 = scalar_lea.vmem %s2866_s28, 1024  ;;  %s2479_s29 = smov [#allocation9]  }
  0x5b   : > { %2092 = vmatprep.mubr.msk.f32.mxu1 %vm2477_vm0, %v2476_v0  ;;  %2100 = vmatprep.subr.mxu1 %v2476_v0  ;;  %v1051_v27 = vsel %vm1050_vm2, 16843009, %v2478_v26  ;;  %p2356_p0 = scmp.ne.s32.totalorder %s2866_s28, %s2355_s18  ;;  %s2359_s25 = sshll.u32 %s2479_s29, 4  ;;  %s2360_s25 = int_to_ptr.vmem [resolvable:$false] %s2359_s25 }
  0x5c   : > { %2088 = vmatmul.mubr.msk.f32.vlgmr.msra.gmra.mxu0 %vm441_vm1, %v418_v11  ;;  %v1052_v28 = vunpack.c.0.s8 %v1051_v27  ;;  %s2361_s7 = scalar_lea.vmem %s2360_s25, 2048  ;;  %p2362_p10 = scmp.lt.s32.totalorder %s2866_s28, %s2360_s25 }
  0x5d   : > { %2096 = vmatpush3.xpose.msk.msra.mxu0 %vm441_vm1, %v428_v14  ;;  %2093 = vmatmul.mubr.msk.f32.vlgmr.msra.gmra.mxu1 %vm441_vm1, %v419_v12  ;;  %p2357_p3 = pnand %p2356_p0, %p2568_p9  ;;  %p2363_p13 = scmp.lt.s32.totalorder %s2361_s7, %s2355_s18 }
  0x5e   : > { %2097 = vmatprep.mubr.msk.f32.mxu0 %vm2477_vm0, %v2476_v0  ;;  %2101 = vmatpush3.xpose.msk.msra.mxu1 %vm441_vm1, %v429_v16  ;;  %vm2749_vm3 = vcmp.ne.s32.totalorder %v1052_v28, 0 }
  0x5f   : > { %2105 = vmatprep.subr.mxu0 %v2476_v0  ;;  %2102 = vmatprep.mubr.msk.f32.mxu1 %vm2477_vm0, %v2476_v0  ;;  %p2358_p4 = pneg %p2357_p3  ;;  %p2364_p12 = por %p2363_p13, %p2362_p10 }
  0x60   : > { %2098 = vmatmul.mubr.msk.f32.vlgmr.msra.gmra.mxu0 %vm441_vm1, %v420_v17  ;;  %2110 = vmatprep.subr.mxu1 %v2476_v0 }
  0x61   : > { %2106 = vmatpush3.xpose.msk.msra.mxu0 %vm441_vm1, %v430_v20  ;;  %2103 = vmatmul.mubr.msk.f32.vlgmr.msra.gmra.mxu1 %vm441_vm1, %v421_v18  ;;  %p2365_p1 = pnand %p2364_p12, %p2358_p4 }
  0x62   : > { %2107 = vmatprep.mubr.msk.f32.mxu0 %vm2477_vm0, %v2476_v0  ;;  %2111 = vmatpush3.xpose.msk.msra.mxu1 %vm441_vm1, %v431_v22 }
  0x63   : > { %2112 = vmatprep.mubr.msk.f32.mxu1 %vm2477_vm0, %v2476_v0  ;;  %2115 = vmatprep.subr.mxu0 %v2476_v0 }
  0x64   : > { %2108 = vmatmul.mubr.msk.f32.vlgmr.msra.gmra.mxu0 %vm441_vm1, %v422_v23  ;;  %2120 = vmatprep.subr.mxu1 %v2476_v0 }
  0x65   : > { %2113 = vmatmul.mubr.msk.f32.vlgmr.msra.gmra.mxu1 %vm441_vm1, %v423_v24  ;;  %2117 = vmatprep.mubr.msk.f32.mxu0 %vm2477_vm0, %v2476_v0 }
  0x66   : > { %2122 = vmatprep.mubr.msk.f32.mxu1 %vm2477_vm0, %v2476_v0 }
 0x118   : > { %v514_v30 = vpop.f32.mrf.mxu0  ;;  %v590_v31 = vpop.f32.mrf.mxu1 }
 0x119   : > { %v1056_v32 = vsel %vm2749_vm3, -1e+09, %v514_v30  ;;  %v1057_v33 = vsel %vm2749_vm3, -1e+09, %v590_v31 }
 0x11a   : > { %v2079_v34 = vpop.f32.mrf.mxu0  ;;  %v1065_v35 = vsel %vm1064_vm4, %v1056_v32, -inf  ;;  %v2084_v36 = vpop.f32.mrf.mxu1  ;;  %v1068_v38 = vsel %vm1064_vm4, %v1057_v33, -inf }
 0x11b   : > { %1066 = vmax.xlane.f32.xlu0 %v1065_v35 }
 0x11c   : > { %v666_v37 = vpop.f32.mrf.mxu0 }
 0x11d   : > { %v1058_v39 = vsel %vm2749_vm3, -1e+09, %v666_v37  ;;  %v742_v40 = vpop.f32.mrf.mxu1 }
 0x11e   : > { %v2089_v41 = vpop.f32.mrf.mxu0  ;;  %v1059_v42 = vsel %vm2749_vm3, -1e+09, %v742_v40  ;;  %v1071_v43 = vsel %vm1064_vm4, %v1058_v39, -inf  ;;  %v433_v40 = vld [vmem:[%s2798_s22 + $0x8] sm:$0xff] }
 0x11f   : > { %1069 = vmax.xlane.f32.xlu0 %v1068_v38  ;;  %1072 = vmax.xlane.f32.xlu1 %v1071_v43  ;;  %v2094_v44 = vpop.f32.mrf.mxu1  ;;  %v1074_v46 = vsel %vm1064_vm4, %v1059_v42, -inf }
 0x120   : > { %v818_v45 = vpop.f32.mrf.mxu0  ;;  %2121 = vmatpush3.msra.mxu1 %v433_v40 }
 0x121   : > { %v1060_v47 = vsel %vm2749_vm3, -1e+09, %v818_v45  ;;  %v894_v48 = vpop.f32.mrf.mxu1  ;;  %2130 = vmatprep.subr.mxu1 %v2476_v0 }
 0x122   : > { %v2099_v49 = vpop.f32.mrf.mxu0  ;;  %v1061_v50 = vsel %vm2749_vm3, -1e+09, %v894_v48  ;;  %v1077_v51 = vsel %vm1064_vm4, %v1060_v47, -inf }
 0x123   : > { %1075 = vmax.xlane.f32.xlu1 %v1074_v46  ;;  %1078 = vmax.xlane.f32.xlu0 %v1077_v51  ;;  %v2104_v52 = vpop.f32.mrf.mxu1  ;;  %v1080_v54 = vsel %vm1064_vm4, %v1061_v50, -inf }
 0x124   : > { %v970_v53 = vpop.f32.mrf.mxu0 }
 0x125   : > { %v1062_v55 = vsel %vm2749_vm3, -1e+09, %v970_v53  ;;  %v1046_v56 = vpop.f32.mrf.mxu1 }
 0x126   : > { %v1063_v57 = vsel %vm2749_vm3, -1e+09, %v1046_v56  ;;  %v1083_v58 = vsel %vm1064_vm4, %v1062_v55, -inf  ;;  %v2109_v59 = vpop.f32.mrf.mxu0 }
 0x127   : > { %1081 = vmax.xlane.f32.xlu1 %v1080_v54  ;;  %1084 = vmax.xlane.f32.xlu0 %v1083_v58  ;;  %v2114_v60 = vpop.f32.mrf.mxu1  ;;  %v1086_v61 = vsel %vm1064_vm4, %v1063_v57, -inf }
 0x12b   : > { %1087 = vmax.xlane.f32.xlu1 %v1086_v61  ;;  %v437_v61 = vld [vmem:[%s2798_s22 + $0x28] sm:$0xff] }
 0x1a4   : > { %v1067_v62 = vpop.xlane.xlu0 %1066 }
 0x1a5   : > { %v1089_v63 = vsub.f32 %v1056_v32, %v1067_v62 }
 0x1a7   : > { %v1097_v1 = vmul.f32 1.442695, %v1089_v63  ;;  %v438_v63 = vld [vmem:[%s2798_s22 + $0x30] sm:$0xff] }
 0x1a8   : > { %v1070_v2 = vpop.xlane.xlu0 %1069  ;;  %v1073_v3 = vpop.xlane.xlu1 %1072 }
 0x1a9   : > { %2239 = vpow2.f32 %v1097_v1  ;;  %v1090_v4 = vsub.f32 %v1057_v33, %v1070_v2  ;;  %v1091_v5 = vsub.f32 %v1058_v39, %v1073_v3  ;;  %v432_v39 = vld [vmem:[%s2798_s22] sm:$0xff] }
 0x1aa   : > { %2116 = vmatpush3.msra.mxu0 %v432_v39 }
 0x1ab   : > { %v1099_v6 = vmul.f32 1.442695, %v1090_v4  ;;  %v1101_v7 = vmul.f32 1.442695, %v1091_v5  ;;  %2125 = vmatprep.subr.mxu0 %v2476_v0  ;;  %v439_v4 = vld [vmem:[%s2798_s22 + $0x38] sm:$0xff] }
 0x1ac   : > { %v1076_v8 = vpop.xlane.xlu1 %1075  ;;  %v1079_v9 = vpop.xlane.xlu0 %1078 }
 0x1ad   : > { %2241 = vpow2.f32 %v1099_v6  ;;  %v1092_v10 = vsub.f32 %v1059_v42, %v1076_v8  ;;  %v1093_v11 = vsub.f32 %v1060_v47, %v1079_v9 }
 0x1ae   : > { %2243 = vpow2.f32 %v1101_v7 }
 0x1af   : > { %v1103_v12 = vmul.f32 1.442695, %v1092_v10  ;;  %v1105_v13 = vmul.f32 1.442695, %v1093_v11 }
 0x1b0   : > { %v1082_v14 = vpop.xlane.xlu1 %1081  ;;  %v1085_v15 = vpop.xlane.xlu0 %1084 }
 0x1b1   : > { %2245 = vpow2.f32 %v1103_v12  ;;  %v1094_v16 = vsub.f32 %v1061_v50, %v1082_v14  ;;  %v1095_v17 = vsub.f32 %v1062_v55, %v1085_v15  ;;  %v434_v50 = vld [vmem:[%s2798_s22 + $0x10] sm:$0xff]  ;;  %v435_v55 = vld [vmem:[%s2798_s22 + $0x18] sm:$0xff] }
 0x1b2   : > { %2247 = vpow2.f32 %v1105_v13 }
 0x1b3   : > { %v1107_v18 = vmul.f32 1.442695, %v1094_v16  ;;  %v1109_v19 = vmul.f32 1.442695, %v1095_v17 }
 0x1b4   : > { %v1088_v20 = vpop.xlane.xlu1 %1087 }
 0x1b5   : > { %2249 = vpow2.f32 %v1107_v18  ;;  %v1096_v21 = vsub.f32 %v1063_v57, %v1088_v20  ;;  %v436_v57 = vld [vmem:[%s2798_s22 + $0x20] sm:$0xff] }
 0x1b6   : > { %v2240_v22 = vpop.eup %2239  ;;  %2251 = vpow2.f32 %v1109_v19 }
 0x1b7   : > { %v1111_v23 = vmul.f32 1.442695, %v1096_v21  ;;  %v1113_v24 = vsel %vm1064_vm4, %v2240_v22, 0.0 }
 0x1b8   : > { %1114 = vadd.xlane.f32.xlu0 %v1113_v24 }
 0x1b9   : > { %2253 = vpow2.f32 %v1111_v23 }
 0x1ba   : > { %v2242_v25 = vpop.eup %2241 }
 0x1bb   : > { %v2244_v26 = vpop.eup %2243  ;;  %v1116_v27 = vsel %vm1064_vm4, %v2242_v25, 0.0 }
 0x1bc   : > { %1117 = vadd.xlane.f32.xlu1 %v1116_v27  ;;  %v1119_v28 = vsel %vm1064_vm4, %v2244_v26, 0.0 }
 0x1bd   : > { %1120 = vadd.xlane.f32.xlu0 %v1119_v28 }
 0x1be   : > { %v2246_v29 = vpop.eup %2245 }
 0x1bf   : > { %v2780_v30 = vpop.eup %2247  ;;  %v1122_v31 = vsel %vm1064_vm4, %v2246_v29, 0.0 }
 0x1c0   : > { %1123 = vadd.xlane.f32.xlu1 %v1122_v31  ;;  %v1125_v32 = vsel %vm1064_vm4, %v2780_v30, 0.0 }
 0x1c1   : > { %1126 = vadd.xlane.f32.xlu0 %v1125_v32 }
 0x1c2   : > { %v2785_v33 = vpop.eup %2249 }
 0x1c3   : > { %v2787_v34 = vpop.eup %2251  ;;  %v1128_v35 = vsel %vm1064_vm4, %v2785_v33, 0.0 }
 0x1c4   : > { %1129 = vadd.xlane.f32.xlu1 %v1128_v35  ;;  %v1131_v36 = vsel %vm1064_vm4, %v2787_v34, 0.0 }
 0x1c5   : > { %1132 = vadd.xlane.f32.xlu0 %v1131_v36 }
 0x1c6   : > { %v2793_v37 = vpop.eup %2253 }
 0x1c7   : > { %v1134_v38 = vsel %vm1064_vm4, %v2793_v37, 0.0 }
 0x1c8   : > { %1135 = vadd.xlane.f32.xlu1 %v1134_v38 }
 0x241   : > { %v1115_v41 = vpop.xlane.xlu0 %1114 }
 0x242   : > { %2255 = vrcp.f32 %v1115_v41 }
 0x245   : > { %v1118_v42 = vpop.xlane.xlu1 %1117 }
 0x246   : > { %2257 = vrcp.f32 %v1118_v42  ;;  %v1121_v43 = vpop.xlane.xlu0 %1120 }
 0x247   : > { %2259 = vrcp.f32 %v1121_v43 }
 0x249   : > { %v1124_v44 = vpop.xlane.xlu1 %1123 }
 0x24a   : > { %2261 = vrcp.f32 %v1124_v44  ;;  %v1127_v45 = vpop.xlane.xlu0 %1126 }
 0x24b   : > { %2263 = vrcp.f32 %v1127_v45 }
 0x24d   : > { %v1130_v46 = vpop.xlane.xlu1 %1129 }
 0x24e   : > { %2265 = vrcp.f32 %v1130_v46  ;;  %v1133_v47 = vpop.xlane.xlu0 %1132 }
 0x24f   : > { %v2256_v48 = vpop.eup %2255  ;;  %2267 = vrcp.f32 %v1133_v47 }
 0x250   : > { %v1145_v49 = vmul.f32 %v2256_v48, %v2240_v22 }
 0x251   : > { %v1136_v51 = vpop.xlane.xlu1 %1135 }
 0x252   : > { %2269 = vrcp.f32 %v1136_v51  ;;  %1153 = vst.msk [vmem:[%s2806_s26] sm:$0xff] %vm1064_vm4, %v1145_v49  ;;  %2118 = vmatmul.mubr.msk.f32.vlgmr.msra.gmra.mxu0 %vm1064_vm4, %v1145_v49 }
 0x253   : > { %v2258_v52 = vpop.eup %2257  ;;  %2126 = vmatpush3.msra.mxu0 %v434_v50  ;;  %2127 = vmatprep.mubr.msk.f32.mxu0 %vm2477_vm0, %v2476_v0 }
 0x254   : > { %v2260_v53 = vpop.eup %2259  ;;  %v1146_v54 = vmul.f32 %v2258_v52, %v2242_v25  ;;  %2135 = vmatprep.subr.mxu0 %v2476_v0 }
 0x255   : > { %v1147_v56 = vmul.f32 %v2260_v53, %v2244_v26 }
 0x256   : > { %1154 = vst.msk [vmem:[%s2806_s26 + $0x8] sm:$0xff] %vm1064_vm4, %v1146_v54  ;;  %2123 = vmatmul.mubr.msk.f32.vlgmr.msra.gmra.mxu1 %vm1064_vm4, %v1146_v54 }
 0x257   : > { %v2262_v58 = vpop.eup %2261  ;;  %1155 = vst.msk [vmem:[%s2806_s26 + $0x10] sm:$0xff] %vm1064_vm4, %v1147_v56  ;;  %2128 = vmatmul.mubr.msk.f32.vlgmr.msra.gmra.mxu0 %vm1064_vm4, %v1147_v56  ;;  %2131 = vmatpush3.msra.mxu1 %v435_v55 }
 0x258   : > { %v2264_v59 = vpop.eup %2263  ;;  %2132 = vmatprep.mubr.msk.f32.mxu1 %vm2477_vm0, %v2476_v0  ;;  %2136 = vmatpush3.msra.mxu0 %v436_v57  ;;  %v1148_v60 = vmul.f32 %v2262_v58, %v2246_v29 }
 0x259   : > { %2137 = vmatprep.mubr.msk.f32.mxu0 %vm2477_vm0, %v2476_v0  ;;  %v1149_v62 = vmul.f32 %v2264_v59, %v2780_v30  ;;  %2140 = vmatprep.subr.mxu1 %v2476_v0 }
 0x25a   : > { %1156 = vst.msk [vmem:[%s2806_s26 + $0x18] sm:$0xff] %vm1064_vm4, %v1148_v60  ;;  %2133 = vmatmul.mubr.msk.f32.vlgmr.msra.gmra.mxu1 %vm1064_vm4, %v1148_v60  ;;  %2145 = vmatprep.subr.mxu0 %v2476_v0 }
 0x25b   : > { %v2266_v1 = vpop.eup %2265  ;;  %1157 = vst.msk [vmem:[%s2806_s26 + $0x20] sm:$0xff] %vm1064_vm4, %v1149_v62  ;;  %2138 = vmatmul.mubr.msk.f32.vlgmr.msra.gmra.mxu0 %vm1064_vm4, %v1149_v62  ;;  %2141 = vmatpush3.msra.mxu1 %v437_v61 }
 0x25c   : > { %v2268_v2 = vpop.eup %2267  ;;  %2142 = vmatprep.mubr.msk.f32.mxu1 %vm2477_vm0, %v2476_v0  ;;  %2146 = vmatpush3.msra.mxu0 %v438_v63  ;;  %v1150_v3 = vmul.f32 %v2266_v1, %v2785_v33 }
 0x25d   : > { %2147 = vmatprep.mubr.msk.f32.mxu0 %vm2477_vm0, %v2476_v0  ;;  %v1151_v5 = vmul.f32 %v2268_v2, %v2787_v34  ;;  %2150 = vmatprep.subr.mxu1 %v2476_v0 }
 0x25e   : > { %1158 = vst.msk [vmem:[%s2806_s26 + $0x28] sm:$0xff] %vm1064_vm4, %v1150_v3  ;;  %2143 = vmatmul.mubr.msk.f32.vlgmr.msra.gmra.mxu1 %vm1064_vm4, %v1150_v3 }
 0x25f   : > { %v2270_v6 = vpop.eup %2269  ;;  %1159 = vst.msk [vmem:[%s2806_s26 + $0x30] sm:$0xff] %vm1064_vm4, %v1151_v5  ;;  %2148 = vmatmul.mubr.msk.f32.vlgmr.msra.gmra.mxu0 %vm1064_vm4, %v1151_v5  ;;  %2151 = vmatpush3.msra.mxu1 %v439_v4 }
 0x260   : > { %2152 = vmatprep.mubr.msk.f32.mxu1 %vm2477_vm0, %v2476_v0  ;;  %v1152_v7 = vmul.f32 %v2270_v6, %v2793_v37 }
 0x262   : > { %1160 = vst.msk [vmem:[%s2806_s26 + $0x38] sm:$0xff] %vm1064_vm4, %v1152_v7  ;;  %2153 = vmatmul.mubr.msk.f32.vlgmr.msra.gmra.mxu1 %vm1064_vm4, %v1152_v7 }
 0x263   : > { %2368 = shalt.err (!%p2365_p1)
}
 0x264   : > { %s2369_s11 = scalar_lea.hbm %s2864_s16, 1024  ;;  %s2373_s30 = scalar_lea.hbm %s2964_s5, 2048 }
 0x265   : > { %p2370_p2 = scmp.ne.s32.totalorder %s2864_s16, %s2369_s11  ;;  %p2374_p7 = scmp.lt.s32.totalorder %s2864_s16, %s2964_s5 }
 0x266   : > { %p2375_p8 = scmp.lt.s32.totalorder %s2373_s30, %s2369_s11 }
 0x267   : > { %p2371_p5 = pnand %p2370_p2, %p2568_p9 }
 0x268   : > { %p2376_p0 = por %p2375_p8, %p2374_p7 }
 0x269   : > { %p2372_p6 = pneg %p2371_p5 }
 0x26b   : > { %p2377_p3 = pnand %p2376_p0, %p2372_p6 }
 0x26d   : > { %2380 = shalt.err (!%p2377_p3)
}
 0x26e   : > { %s2480_s17 = smov 128   ;;  %s2481_s22 = smov 8  }
 0x26f   : > { %2162 = dma.vmem_to_hbm [thread:$0]  (%p2568_p9), %s2866_s28, 1024, %s2864_s16, %s1759_s1, %s2480_s17, %s2480_s17, %s2481_s22  }
 0x270   : > { %s386_s26 = scalar_lea.vmem [#allocation8], %s2664_s12  ;;  %s2909_s14 = scalar_lea.hbm %s2963_s4, %s2041_s8 }
 0x271   : > { %s1775_s12 = sshll.u32 %s386_s26, 4  ;;  %s1754_s16 = scalar_lea.sflag [#allocation4], %s2661_s10  ;;  %s2901_s12 = int_to_ptr.vmem [resolvable:$true] %s1775_s12 }
 0x272   : > { %s2381_s1 = scalar_lea.vmem %s2901_s12, 1024  ;;  %s2482_s18 = smov [#allocation8]  }
 0x273   : > { %p2382_p4 = scmp.ne.s32.totalorder %s2901_s12, %s2381_s1  ;;  %s2385_s29 = sshll.u32 %s2482_s18, 4  ;;  %s2386_s29 = int_to_ptr.vmem [resolvable:$false] %s2385_s29 }
 0x274   : > { %s2387_s25 = scalar_lea.vmem %s2386_s29, 2048  ;;  %p2388_p12 = scmp.lt.s32.totalorder %s2901_s12, %s2386_s29 }
 0x275   : > { %p2383_p10 = pnand %p2382_p4, %p2568_p9  ;;  %p2389_p1 = scmp.lt.s32.totalorder %s2387_s25, %s2381_s1 }
 0x277   : > { %p2384_p13 = pneg %p2383_p10  ;;  %p2390_p2 = por %p2389_p1, %p2388_p12 }
 0x279   : > { %p2391_p5 = pnand %p2390_p2, %p2384_p13 }
 0x312   : > { %v1230_v0 = vpop.f32.mrf.mxu0 }
 0x313   : > { %1745 = vst.msk [vmem:[%s386_s26] sm:$0xff] %vm441_vm1, %v1230_v0 }
 0x314   : > { %v2119_v8 = vpop.f32.mrf.mxu0 }
 0x316   : > { %v1303_v9 = vpop.f32.mrf.mxu1 }
 0x317   : > { %1746 = vst.msk [vmem:[%s386_s26 + $0x8] sm:$0xff] %vm441_vm1, %v1303_v9  ;;  %v1376_v10 = vpop.f32.mrf.mxu0 }
 0x318   : > { %1747 = vst.msk [vmem:[%s386_s26 + $0x10] sm:$0xff] %vm441_vm1, %v1376_v10  ;;  %v2124_v11 = vpop.f32.mrf.mxu1 }
 0x319   : > { %v2129_v12 = vpop.f32.mrf.mxu0 }
 0x31a   : > { %v1449_v13 = vpop.f32.mrf.mxu1 }
 0x31b   : > { %1748 = vst.msk [vmem:[%s386_s26 + $0x18] sm:$0xff] %vm441_vm1, %v1449_v13  ;;  %v1522_v14 = vpop.f32.mrf.mxu0 }
 0x31c   : > { %1749 = vst.msk [vmem:[%s386_s26 + $0x20] sm:$0xff] %vm441_vm1, %v1522_v14  ;;  %v2134_v15 = vpop.f32.mrf.mxu1 }
 0x31d   : > { %v2139_v16 = vpop.f32.mrf.mxu0 }
 0x31e   : > { %v1595_v17 = vpop.f32.mrf.mxu1 }
 0x31f   : > { %1750 = vst.msk [vmem:[%s386_s26 + $0x28] sm:$0xff] %vm441_vm1, %v1595_v17  ;;  %v1668_v18 = vpop.f32.mrf.mxu0 }
 0x320   : > { %1751 = vst.msk [vmem:[%s386_s26 + $0x30] sm:$0xff] %vm441_vm1, %v1668_v18  ;;  %v2144_v19 = vpop.f32.mrf.mxu1 }
 0x321   : > { %v2149_v20 = vpop.f32.mrf.mxu0 }
 0x322   : > { %v1741_v21 = vpop.f32.mrf.mxu1 }
 0x323   : > { %1752 = vst.msk [vmem:[%s386_s26 + $0x38] sm:$0xff] %vm441_vm1, %v1741_v21 }
 0x324   : > { %v2154_v22 = vpop.f32.mrf.mxu1 }
 0x325   : > { %2394 = shalt.err (!%p2391_p5)
}
 0x326   : > { %s2395_s21 = scalar_lea.hbm %s2909_s14, 1024  ;;  %s2399_s7 = scalar_lea.hbm %s2963_s4, 2048 }
 0x327   : > { %p2396_p6 = scmp.ne.s32.totalorder %s2909_s14, %s2395_s21  ;;  %p2400_p0 = scmp.lt.s32.totalorder %s2909_s14, %s2963_s4 }
 0x328   : > { %p2401_p3 = scmp.lt.s32.totalorder %s2399_s7, %s2395_s21 }
 0x329   : > { %p2397_p7 = pnand %p2396_p6, %p2568_p9 }
 0x32a   : > { %p2402_p4 = por %p2401_p3, %p2400_p0 }
 0x32b   : > { %p2398_p8 = pneg %p2397_p7 }
 0x32d   : > { %p2403_p10 = pnand %p2402_p4, %p2398_p8 }
 0x32f   : > { %2406 = shalt.err (!%p2403_p10)
}
 0x330   : > { %2161 = dma.vmem_to_hbm [thread:$0]  (%p2568_p9), %s2901_s12, 1024, %s2909_s14, %s1754_s16, %s2480_s17, %s2480_s17, %s2481_s22  }
 0x331 PF: > { %s2989_s24 = sld [smem:[#allocation15_spill]]  ;;  %p2991_p13 = scmp.ge.s32.totalorder %s2469_s23, 2 }
 0x333   : > { %p2176_p12 = pnand %p2991_p13, %p2575_p11 }
 0x335   : > { %p2177_p1 = pneg %p2176_p12 }
 0x337   : > { %s1809_s13 = sand.u32 1, %s2989_s24  }
 0x338   : > { %s1810_s9 = scalar_lea.sflag [#allocation4], %s1809_s13 }
 0x339   : > { %2440 = dma.done.wait (%p2177_p1), %s1810_s9, 1024  }
 0x33a   : > { %2442 = vsyncadd (%p2177_p1), %s1810_s9, 4294966272  ;;  %s1819_s26 = scalar_lea.sflag [#allocation10], %s1809_s13 }
 0x33b   : > { %2444 = dma.done.wait (%p2177_p1), %s1819_s26, 1024  }
 0x33c   : > { %2446 = vsyncadd (%p2177_p1), %s1819_s26, 4294966272  ;;  %s28_s23 = sadd.s32 1, %s2469_s23   ;;  %s2992_s6 = sld [smem:[#allocation18_spill]] }
 0x33d   : > { %p25_p2 = scmp.ge.s32.totalorder %s28_s23, 4   ;;  %s2993_s21 = sld [smem:[#allocation16_spill]] }
 0x33e   : > { %s2994_s22 = sld [smem:[#allocation17_spill]]  ;;  %s2995_s18 = smov %s2453_s19 }
 0x33f   : > { %s2996_s19 = smov %s2457_s20  ;;  %27 = sbr.rel (!%p25_p2) target bundleno = 12 (0xc), region = 125 }
 0x342   : > { %s2997_s20 = smov %s2992_s6 }
 0x344   :  { %1824 = vsyncpa [#allocation3], 1 }
 0x345   :  { %1826 = vsyncpa [#allocation3 + $0x1], 1 }
 0x346   :  { %1827 = vsyncpa [#allocation6], 1 }
 0x347   :  { %1829 = vsyncpa [#allocation6 + $0x1], 1 }
 0x348   :  { %1830 = vsyncpa [#allocation4], 1 }
 0x349   :  { %1832 = vsyncpa [#allocation4 + $0x1], 1 }
 0x34a   :  { %1833 = vsyncpa [#allocation10], 1 }
 0x34b   :  { %1835 = vsyncpa [#allocation10 + $0x1], 1 }

</bundles_post_ra>
